<compile_context>
chip_gen: v7x
topology: tpu7x:2x2x1
jax: 0.10.0
libtpu: 0.0.40
codegen_flags: <defaults>
</compile_context>

<pallas_src>
import functools
import math

import jax
import jax.numpy as jnp
from jax.experimental import pallas as pl
from jax.experimental.pallas import tpu as pltpu


def _make_kernel(num_heads, head_dim, out_pad, matmul_dtype):
    inv_sqrt_d = 1.0 / math.sqrt(head_dim)

    def kernel(x_ref, wqkv_ref, bqkv_ref, wo_ref, bo_ref, out_ref, attn_ref):
        n = x_ref.shape[0]

        # Fused Q|K|V projection for all heads: one wide MXU pass (lane width 3*H*D).
        # bf16 operands, f32 accumulation; bias add in f32.
        x = x_ref[...].astype(matmul_dtype)
        qkv = jnp.dot(x, wqkv_ref[...],
                      preferred_element_type=jnp.float32) + bqkv_ref[...]   # [N, 3*H*D] f32

        out_acc = jnp.zeros((n, out_pad), jnp.float32)

        for h in range(num_heads):          # unrolled; static head-major 3*D-lane window
            base = 3 * head_dim * h
            q = qkv[:, base:base + head_dim] * inv_sqrt_d   # fold 1/sqrt(D): N*D mults, not N^2
            k = qkv[:, base + head_dim:base + 2 * head_dim]
            v = qkv[:, base + 2 * head_dim:base + 3 * head_dim]

            # Scores: contract over D without an explicit transpose.  bf16 operands on
            # the MXU (~2x f32 throughput on all generations), f32 accumulation.
            s = jax.lax.dot_general(q.astype(matmul_dtype), k.astype(matmul_dtype),
                                    (((1,), (1,)), ((), ())),
                                    preferred_element_type=jnp.float32)      # [N, N] f32

            # Numerically stable softmax; all element-wise math in f32.  The stored,
            # user-visible attention uses an EXACT reciprocal (rows sum to 1).
            s = s - jnp.max(s, axis=-1, keepdims=True)
            e = jnp.exp(s)
            attn = e * pl.reciprocal(jnp.sum(e, axis=-1, keepdims=True), approx=False)
            attn_ref[h] = attn
            # NOTE: attn last dim is N (not a multiple of 128) -> masked stores; padding
            # it lane-dense only matters once N is in the hundreds (design note above).

            # Per-head attended values, then accumulate this head's slice of the output
            # projection (replaces the old concat over heads, which materialized 16-lane
            # shuffles/copies).  Wo row-slices (multiples of head_dim=16) are
            # sublane-aligned views.
            av = jnp.dot(attn.astype(matmul_dtype), v.astype(matmul_dtype),
                         preferred_element_type=jnp.float32)                 # [N, D] f32
            wo_h = wo_ref[h * head_dim:(h + 1) * head_dim, :]                # [D, out_pad]
            out_acc = out_acc + jnp.dot(av.astype(matmul_dtype), wo_h,
                                        preferred_element_type=jnp.float32)

        out_ref[...] = (out_acc + bo_ref[...]).astype(out_ref.dtype)         # [N, out_pad]

    return kernel


def prepare_encoder_params(params, num_heads, head_dim, out_dim,
                           matmul_dtype=jnp.bfloat16):
    """Fuse / pad / cast the weights ONCE at setup time (hoisted out of the per-call path).

    Note: the reference module's parameter ``self.b`` (shape [num_heads]) is never used
    in its forward(), so it intentionally has no counterpart in this parameter tree.
    """
    hd = num_heads * head_dim
    out_pad = 128 * pl.cdiv(out_dim, 128)

    # Head-major fused QKV columns: [q_0 | k_0 | v_0 | q_1 | k_1 | v_1 | ...] so each
    # head's q/k/v come from one contiguous 3*D-lane window of the projection output.
    cols, bias = [], []
    for h in range(num_heads):
        sl = slice(h * head_dim, (h + 1) * head_dim)
        cols += [params["wq"][:, sl], params["wk"][:, sl], params["wv"][:, sl]]
        bias += [params["bq"][sl], params["bk"][sl], params["bv"][sl]]
    w_qkv = jnp.concatenate(cols, axis=1).astype(matmul_dtype)          # [hidden, 3*H*D]
    b_qkv = jnp.concatenate(bias).reshape(1, 3 * hd).astype(jnp.float32)

    # Lane-dense (128-padded) output projection: kernel stores a full [N, out_pad] slab
    # with unmasked stores; wrapper slices back to out_dim.
    wo_pad = jnp.zeros((hd, out_pad), jnp.float32).at[:, :out_dim].set(params["wo"])
    bo_pad = jnp.zeros((1, out_pad), jnp.float32).at[:, :out_dim].set(params["bo"])

    return {
        "w_qkv": w_qkv,
        "b_qkv": b_qkv,
        "wo": wo_pad.astype(matmul_dtype),
        "bo": bo_pad,
    }


@functools.partial(jax.jit, static_argnames=("num_heads", "head_dim", "out_dim"))
def encoder_layer_forward(x, fused, num_heads, head_dim, out_dim):
    """x: [N, hidden] float32; fused = prepare_encoder_params(...).
    Returns (output [N, out_dim] f32, attn [num_heads, N, N] f32)."""
    N, hidden = x.shape
    hd = num_heads * head_dim
    out_pad = 128 * pl.cdiv(out_dim, 128)
    matmul_dtype = fused["w_qkv"].dtype
    itm = jnp.dtype(matmul_dtype).itemsize

    # Scoped-VMEM budget derived from the actual resident footprint of the
    # single-invocation design, with 2x headroom; clamped to 64 MiB so the same config
    # never exceeds v7x's physical VMEM (and floored at 16 MiB).
    footprint = (
        N * hidden * 4                           # x (f32 input)
        + hidden * 3 * hd * itm + 3 * hd * 4     # W_qkv / b_qkv
        + hd * out_pad * itm + out_pad * 4       # Wo / bo
        + N * 3 * hd * 4                         # qkv activations (f32)
        + 4 * N * N * 4                          # live score / exp / attn temporaries
        + num_heads * N * N * 4                  # [H, N, N] attention output slab
        + 2 * N * out_pad * 4                    # output accumulator + padded output slab
    )
    vmem_limit = int(min(max(2 * footprint, 16 << 20), 64 << 20))

    kernel = _make_kernel(num_heads, head_dim, out_pad, matmul_dtype)
    vmem = pl.BlockSpec(memory_space=pltpu.MemorySpace.VMEM)

    out_padded, attn = pl.pallas_call(
        kernel,
        out_shape=(
            jax.ShapeDtypeStruct((N, out_pad), jnp.float32),
            jax.ShapeDtypeStruct((num_heads, N, N), jnp.float32),
        ),
        in_specs=[vmem] * 5,          # whole arrays resident in VMEM, single invocation
        out_specs=(vmem, vmem),
        compiler_params=pltpu.CompilerParams(vmem_limit_bytes=vmem_limit),
    )(x, fused["w_qkv"], fused["b_qkv"], fused["wo"], fused["bo"])

    return out_padded[:, :out_dim], attn


def reference_forward(x, params, num_heads, head_dim, out_dim):
    """Pure-JAX reference replicating the PyTorch forward exactly (f32 throughout)."""
    N = x.shape[0]
    q = (x @ params["wq"] + params["bq"]).reshape(N, num_heads, head_dim).transpose(1, 0, 2)
    k = (x @ params["wk"] + params["bk"]).reshape(N, num_heads, head_dim).transpose(1, 0, 2)
    v = (x @ params["wv"] + params["bv"]).reshape(N, num_heads, head_dim).transpose(1, 0, 2)
    qk = jnp.einsum("hnd,hmd->hnm", q, k) / math.sqrt(head_dim)
    attn = jax.nn.softmax(qk, axis=-1)
    av = jnp.einsum("hnm,hmd->hnd", attn, v).transpose(1, 0, 2).reshape(N, num_heads * head_dim)
    out = av @ params["wo"] + params["bo"]
    return out, attn


if __name__ == "__main__":
    # Small shapes implied by the module: x [node_num, hidden_size].
    N = 8            # node_num
    hidden = 32      # hidden_size
    out_dim = 16     # output_size (= per-head dim)
    num_heads = 4
    head_dim = out_dim

    key = jax.random.PRNGKey(0)
    ks = jax.random.split(key, 10)
    scale = 0.1
    params = {
        "wq": scale * jax.random.normal(ks[0], (hidden, num_heads * head_dim), jnp.float32),
        "bq": scale * jax.random.normal(ks[1], (num_heads * head_dim,), jnp.float32),
        "wk": scale * jax.random.normal(ks[2], (hidden, num_heads * head_dim), jnp.float32),
        "bk": scale * jax.random.normal(ks[3], (num_heads * head_dim,), jnp.float32),
        "wv": scale * jax.random.normal(ks[4], (hidden, num_heads * head_dim), jnp.float32),
        "bv": scale * jax.random.normal(ks[5], (num_heads * head_dim,), jnp.float32),
        "wo": scale * jax.random.normal(ks[6], (num_heads * head_dim, out_dim), jnp.float32),
        "bo": scale * jax.random.normal(ks[7], (out_dim,), jnp.float32),
    }
    x = jax.random.normal(ks[8], (N, hidden), jnp.float32)

    # Weight fusion / padding / bf16 cast done once at setup; forward is jitted.
    fused = prepare_encoder_params(params, num_heads, head_dim, out_dim,
                                   matmul_dtype=jnp.bfloat16)

    out, attn = encoder_layer_forward(x, fused, num_heads, head_dim, out_dim)
    out = jax.block_until_ready(out)
    attn = jax.block_until_ready(attn)

    ref_out, ref_attn = reference_forward(x, params, num_heads, head_dim, out_dim)
    assert out.shape == (N, out_dim)
    assert attn.shape == (num_heads, N, N)
    # Tolerance covers the bf16 MXU-operand cast (softmax/accumulation stay f32; the
    # stored attention is exactly normalized).
    assert jnp.allclose(out, ref_out, atol=1e-2, rtol=1e-2)
    assert jnp.allclose(attn, ref_attn, atol=1e-2, rtol=1e-2)
    # Sanity: stored attention rows sum to ~1 (exact reciprocal path).
    assert jnp.allclose(jnp.sum(attn, axis=-1), 1.0, atol=1e-4)

    print("KERNEL_OK")
</pallas_src>

<mosaic_0001>
module attributes {stable_mosaic.version = 11 : i64} {
  func.func @kernel(%arg0: memref<8x32xf32, #tpu.memory_space<vmem>>, %arg1: memref<32x192xbf16, #tpu.memory_space<vmem>>, %arg2: memref<1x192xf32, #tpu.memory_space<vmem>>, %arg3: memref<64x128xbf16, #tpu.memory_space<vmem>>, %arg4: memref<1x128xf32, #tpu.memory_space<vmem>>, %arg5: memref<8x128xf32, #tpu.memory_space<vmem>>, %arg6: memref<4x8x8xf32, #tpu.memory_space<vmem>>) attributes {dimension_semantics = [], scalar_prefetch = 0 : i64, scratch_operands = 0 : i64, tpu.core_type = #tpu.core_type<tc>} {
    %c0 = arith.constant 0 : index
    %c0_0 = arith.constant 0 : index
    %0 = vector.load %arg0[%c0, %c0_0] : memref<8x32xf32, #tpu.memory_space<vmem>>, vector<8x32xf32>
    %1 = arith.truncf %0 : vector<8x32xf32> to vector<8x32xbf16>
    %c0_1 = arith.constant 0 : index
    %c0_2 = arith.constant 0 : index
    %2 = vector.load %arg1[%c0_1, %c0_2] : memref<32x192xbf16, #tpu.memory_space<vmem>>, vector<32x192xbf16>
    %cst = arith.constant dense<0.000000e+00> : vector<8x192xf32>
    %3 = tpu.matmul %1, %2, %cst {dimension_numbers = #tpu.dot_dimension_numbers<[1], [0], [0], [1], [0, 0, 1, 1], [], []>} : vector<8x32xbf16>, vector<32x192xbf16>, vector<8x192xf32> -> vector<8x192xf32>
    %c0_3 = arith.constant 0 : index
    %c0_4 = arith.constant 0 : index
    %4 = vector.load %arg2[%c0_3, %c0_4] : memref<1x192xf32, #tpu.memory_space<vmem>>, vector<1x192xf32>
    %5 = vector.broadcast %4 : vector<1x192xf32> to vector<8x192xf32>
    %6 = arith.addf %3, %5 : vector<8x192xf32>
    %cst_5 = arith.constant 0.000000e+00 : f32
    %7 = vector.broadcast %cst_5 : f32 to vector<8x128xf32>
    %8 = vector.extract_strided_slice %6 {offsets = [0, 0], sizes = [8, 16], strides = [1, 1]} : vector<8x192xf32> to vector<8x16xf32>
    %cst_6 = arith.constant 2.500000e-01 : f32
    %9 = vector.broadcast %cst_6 : f32 to vector<8x16xf32>
    %10 = arith.mulf %8, %9 : vector<8x16xf32>
    %11 = vector.extract_strided_slice %6 {offsets = [0, 16], sizes = [8, 16], strides = [1, 1]} : vector<8x192xf32> to vector<8x16xf32>
    %12 = vector.extract_strided_slice %6 {offsets = [0, 32], sizes = [8, 16], strides = [1, 1]} : vector<8x192xf32> to vector<8x16xf32>
    %13 = arith.truncf %10 : vector<8x16xf32> to vector<8x16xbf16>
    %14 = arith.truncf %11 : vector<8x16xf32> to vector<8x16xbf16>
    %cst_7 = arith.constant dense<0.000000e+00> : vector<8x8xf32>
    %15 = tpu.matmul %13, %14, %cst_7 {dimension_numbers = #tpu.dot_dimension_numbers<[1], [1], [0], [0], [0, 0, 1, 0], [], []>} : vector<8x16xbf16>, vector<8x16xbf16>, vector<8x8xf32> -> vector<8x8xf32>
    %cst_8 = arith.constant dense<0xFF800000> : vector<8xf32>
    %16 = vector.multi_reduction <maximumf>, %15, %cst_8 [1] : vector<8x8xf32> to vector<8xf32>
    %17 = vector.shape_cast %16 : vector<8xf32> to vector<8x1xf32>
    %18 = vector.broadcast %17 : vector<8x1xf32> to vector<8x8xf32>
    %19 = arith.subf %15, %18 : vector<8x8xf32>
    %20 = math.exp %19 : vector<8x8xf32>
    %cst_9 = arith.constant dense<0.000000e+00> : vector<8xf32>
    %21 = vector.multi_reduction <add>, %20, %cst_9 [1] : vector<8x8xf32> to vector<8xf32>
    %22 = vector.shape_cast %21 : vector<8xf32> to vector<8x1xf32>
    %23 = tpu.reciprocal %22 : vector<8x1xf32> -> vector<8x1xf32>
    %24 = vector.broadcast %23 : vector<8x1xf32> to vector<8x8xf32>
    %25 = arith.mulf %20, %24 : vector<8x8xf32>
    %c0_10 = arith.constant 0 : index
    %c0_11 = arith.constant 0 : index
    %c0_12 = arith.constant 0 : index
    %26 = vector.load %arg6[%c0_10, %c0_11, %c0_12] : memref<4x8x8xf32, #tpu.memory_space<vmem>>, vector<1x8x8xf32>
    %27 = vector.shape_cast %26 : vector<1x8x8xf32> to vector<8x8xf32>
    %28 = vector.shape_cast %25 : vector<8x8xf32> to vector<1x8x8xf32>
    tpu.vector_store %arg6[%c0_10, %c0_11, %c0_12], %28 {strides = array<i32>} : memref<4x8x8xf32, #tpu.memory_space<vmem>>, vector<1x8x8xf32>,
    %29 = arith.truncf %25 : vector<8x8xf32> to vector<8x8xbf16>
    %30 = arith.truncf %12 : vector<8x16xf32> to vector<8x16xbf16>
    %cst_13 = arith.constant dense<0.000000e+00> : vector<8x16xf32>
    %31 = tpu.matmul %29, %30, %cst_13 {dimension_numbers = #tpu.dot_dimension_numbers<[1], [0], [0], [1], [0, 0, 1, 1], [], []>} : vector<8x8xbf16>, vector<8x16xbf16>, vector<8x16xf32> -> vector<8x16xf32>
    %c0_14 = arith.constant 0 : index
    %c0_15 = arith.constant 0 : index
    %32 = vector.load %arg3[%c0_14, %c0_15] : memref<64x128xbf16, #tpu.memory_space<vmem>>, vector<16x128xbf16>
    %33 = arith.truncf %31 : vector<8x16xf32> to vector<8x16xbf16>
    %cst_16 = arith.constant dense<0.000000e+00> : vector<8x128xf32>
    %34 = tpu.matmul %33, %32, %cst_16 {dimension_numbers = #tpu.dot_dimension_numbers<[1], [0], [0], [1], [0, 0, 1, 1], [], []>} : vector<8x16xbf16>, vector<16x128xbf16>, vector<8x128xf32> -> vector<8x128xf32>
    %35 = arith.addf %7, %34 : vector<8x128xf32>
    %36 = vector.extract_strided_slice %6 {offsets = [0, 48], sizes = [8, 16], strides = [1, 1]} : vector<8x192xf32> to vector<8x16xf32>
    %cst_17 = arith.constant 2.500000e-01 : f32
    %37 = vector.broadcast %cst_17 : f32 to vector<8x16xf32>
    %38 = arith.mulf %36, %37 : vector<8x16xf32>
    %39 = vector.extract_strided_slice %6 {offsets = [0, 64], sizes = [8, 16], strides = [1, 1]} : vector<8x192xf32> to vector<8x16xf32>
    %40 = vector.extract_strided_slice %6 {offsets = [0, 80], sizes = [8, 16], strides = [1, 1]} : vector<8x192xf32> to vector<8x16xf32>
    %41 = arith.truncf %38 : vector<8x16xf32> to vector<8x16xbf16>
    %42 = arith.truncf %39 : vector<8x16xf32> to vector<8x16xbf16>
    %cst_18 = arith.constant dense<0.000000e+00> : vector<8x8xf32>
    %43 = tpu.matmul %41, %42, %cst_18 {dimension_numbers = #tpu.dot_dimension_numbers<[1], [1], [0], [0], [0, 0, 1, 0], [], []>} : vector<8x16xbf16>, vector<8x16xbf16>, vector<8x8xf32> -> vector<8x8xf32>
    %cst_19 = arith.constant dense<0xFF800000> : vector<8xf32>
    %44 = vector.multi_reduction <maximumf>, %43, %cst_19 [1] : vector<8x8xf32> to vector<8xf32>
    %45 = vector.shape_cast %44 : vector<8xf32> to vector<8x1xf32>
    %46 = vector.broadcast %45 : vector<8x1xf32> to vector<8x8xf32>
    %47 = arith.subf %43, %46 : vector<8x8xf32>
    %48 = math.exp %47 : vector<8x8xf32>
    %cst_20 = arith.constant dense<0.000000e+00> : vector<8xf32>
    %49 = vector.multi_reduction <add>, %48, %cst_20 [1] : vector<8x8xf32> to vector<8xf32>
    %50 = vector.shape_cast %49 : vector<8xf32> to vector<8x1xf32>
    %51 = tpu.reciprocal %50 : vector<8x1xf32> -> vector<8x1xf32>
    %52 = vector.broadcast %51 : vector<8x1xf32> to vector<8x8xf32>
    %53 = arith.mulf %48, %52 : vector<8x8xf32>
    %c1 = arith.constant 1 : index
    %c0_21 = arith.constant 0 : index
    %c0_22 = arith.constant 0 : index
    %54 = vector.load %arg6[%c1, %c0_21, %c0_22] : memref<4x8x8xf32, #tpu.memory_space<vmem>>, vector<1x8x8xf32>
    %55 = vector.shape_cast %54 : vector<1x8x8xf32> to vector<8x8xf32>
    %56 = vector.shape_cast %53 : vector<8x8xf32> to vector<1x8x8xf32>
    tpu.vector_store %arg6[%c1, %c0_21, %c0_22], %56 {strides = array<i32>} : memref<4x8x8xf32, #tpu.memory_space<vmem>>, vector<1x8x8xf32>,
    %57 = arith.truncf %53 : vector<8x8xf32> to vector<8x8xbf16>
    %58 = arith.truncf %40 : vector<8x16xf32> to vector<8x16xbf16>
    %cst_23 = arith.constant dense<0.000000e+00> : vector<8x16xf32>
    %59 = tpu.matmul %57, %58, %cst_23 {dimension_numbers = #tpu.dot_dimension_numbers<[1], [0], [0], [1], [0, 0, 1, 1], [], []>} : vector<8x8xbf16>, vector<8x16xbf16>, vector<8x16xf32> -> vector<8x16xf32>
    %c16 = arith.constant 16 : index
    %c0_24 = arith.constant 0 : index
    %60 = vector.load %arg3[%c16, %c0_24] : memref<64x128xbf16, #tpu.memory_space<vmem>>, vector<16x128xbf16>
    %61 = arith.truncf %59 : vector<8x16xf32> to vector<8x16xbf16>
    %cst_25 = arith.constant dense<0.000000e+00> : vector<8x128xf32>
    %62 = tpu.matmul %61, %60, %cst_25 {dimension_numbers = #tpu.dot_dimension_numbers<[1], [0], [0], [1], [0, 0, 1, 1], [], []>} : vector<8x16xbf16>, vector<16x128xbf16>, vector<8x128xf32> -> vector<8x128xf32>
    %63 = arith.addf %35, %62 : vector<8x128xf32>
    %64 = vector.extract_strided_slice %6 {offsets = [0, 96], sizes = [8, 16], strides = [1, 1]} : vector<8x192xf32> to vector<8x16xf32>
    %cst_26 = arith.constant 2.500000e-01 : f32
    %65 = vector.broadcast %cst_26 : f32 to vector<8x16xf32>
    %66 = arith.mulf %64, %65 : vector<8x16xf32>
    %67 = vector.extract_strided_slice %6 {offsets = [0, 112], sizes = [8, 16], strides = [1, 1]} : vector<8x192xf32> to vector<8x16xf32>
    %68 = vector.extract_strided_slice %6 {offsets = [0, 128], sizes = [8, 16], strides = [1, 1]} : vector<8x192xf32> to vector<8x16xf32>
    %69 = arith.truncf %66 : vector<8x16xf32> to vector<8x16xbf16>
    %70 = arith.truncf %67 : vector<8x16xf32> to vector<8x16xbf16>
    %cst_27 = arith.constant dense<0.000000e+00> : vector<8x8xf32>
    %71 = tpu.matmul %69, %70, %cst_27 {dimension_numbers = #tpu.dot_dimension_numbers<[1], [1], [0], [0], [0, 0, 1, 0], [], []>} : vector<8x16xbf16>, vector<8x16xbf16>, vector<8x8xf32> -> vector<8x8xf32>
    %cst_28 = arith.constant dense<0xFF800000> : vector<8xf32>
    %72 = vector.multi_reduction <maximumf>, %71, %cst_28 [1] : vector<8x8xf32> to vector<8xf32>
    %73 = vector.shape_cast %72 : vector<8xf32> to vector<8x1xf32>
    %74 = vector.broadcast %73 : vector<8x1xf32> to vector<8x8xf32>
    %75 = arith.subf %71, %74 : vector<8x8xf32>
    %76 = math.exp %75 : vector<8x8xf32>
    %cst_29 = arith.constant dense<0.000000e+00> : vector<8xf32>
    %77 = vector.multi_reduction <add>, %76, %cst_29 [1] : vector<8x8xf32> to vector<8xf32>
    %78 = vector.shape_cast %77 : vector<8xf32> to vector<8x1xf32>
    %79 = tpu.reciprocal %78 : vector<8x1xf32> -> vector<8x1xf32>
    %80 = vector.broadcast %79 : vector<8x1xf32> to vector<8x8xf32>
    %81 = arith.mulf %76, %80 : vector<8x8xf32>
    %c2 = arith.constant 2 : index
    %c0_30 = arith.constant 0 : index
    %c0_31 = arith.constant 0 : index
    %82 = vector.load %arg6[%c2, %c0_30, %c0_31] : memref<4x8x8xf32, #tpu.memory_space<vmem>>, vector<1x8x8xf32>
    %83 = vector.shape_cast %82 : vector<1x8x8xf32> to vector<8x8xf32>
    %84 = vector.shape_cast %81 : vector<8x8xf32> to vector<1x8x8xf32>
    tpu.vector_store %arg6[%c2, %c0_30, %c0_31], %84 {strides = array<i32>} : memref<4x8x8xf32, #tpu.memory_space<vmem>>, vector<1x8x8xf32>,
    %85 = arith.truncf %81 : vector<8x8xf32> to vector<8x8xbf16>
    %86 = arith.truncf %68 : vector<8x16xf32> to vector<8x16xbf16>
    %cst_32 = arith.constant dense<0.000000e+00> : vector<8x16xf32>
    %87 = tpu.matmul %85, %86, %cst_32 {dimension_numbers = #tpu.dot_dimension_numbers<[1], [0], [0], [1], [0, 0, 1, 1], [], []>} : vector<8x8xbf16>, vector<8x16xbf16>, vector<8x16xf32> -> vector<8x16xf32>
    %c32 = arith.constant 32 : index
    %c0_33 = arith.constant 0 : index
    %88 = vector.load %arg3[%c32, %c0_33] : memref<64x128xbf16, #tpu.memory_space<vmem>>, vector<16x128xbf16>
    %89 = arith.truncf %87 : vector<8x16xf32> to vector<8x16xbf16>
    %cst_34 = arith.constant dense<0.000000e+00> : vector<8x128xf32>
    %90 = tpu.matmul %89, %88, %cst_34 {dimension_numbers = #tpu.dot_dimension_numbers<[1], [0], [0], [1], [0, 0, 1, 1], [], []>} : vector<8x16xbf16>, vector<16x128xbf16>, vector<8x128xf32> -> vector<8x128xf32>
    %91 = arith.addf %63, %90 : vector<8x128xf32>
    %92 = vector.extract_strided_slice %6 {offsets = [0, 144], sizes = [8, 16], strides = [1, 1]} : vector<8x192xf32> to vector<8x16xf32>
    %cst_35 = arith.constant 2.500000e-01 : f32
    %93 = vector.broadcast %cst_35 : f32 to vector<8x16xf32>
    %94 = arith.mulf %92, %93 : vector<8x16xf32>
    %95 = vector.extract_strided_slice %6 {offsets = [0, 160], sizes = [8, 16], strides = [1, 1]} : vector<8x192xf32> to vector<8x16xf32>
    %96 = vector.extract_strided_slice %6 {offsets = [0, 176], sizes = [8, 16], strides = [1, 1]} : vector<8x192xf32> to vector<8x16xf32>
    %97 = arith.truncf %94 : vector<8x16xf32> to vector<8x16xbf16>
    %98 = arith.truncf %95 : vector<8x16xf32> to vector<8x16xbf16>
    %cst_36 = arith.constant dense<0.000000e+00> : vector<8x8xf32>
    %99 = tpu.matmul %97, %98, %cst_36 {dimension_numbers = #tpu.dot_dimension_numbers<[1], [1], [0], [0], [0, 0, 1, 0], [], []>} : vector<8x16xbf16>, vector<8x16xbf16>, vector<8x8xf32> -> vector<8x8xf32>
    %cst_37 = arith.constant dense<0xFF800000> : vector<8xf32>
    %100 = vector.multi_reduction <maximumf>, %99, %cst_37 [1] : vector<8x8xf32> to vector<8xf32>
    %101 = vector.shape_cast %100 : vector<8xf32> to vector<8x1xf32>
    %102 = vector.broadcast %101 : vector<8x1xf32> to vector<8x8xf32>
    %103 = arith.subf %99, %102 : vector<8x8xf32>
    %104 = math.exp %103 : vector<8x8xf32>
    %cst_38 = arith.constant dense<0.000000e+00> : vector<8xf32>
    %105 = vector.multi_reduction <add>, %104, %cst_38 [1] : vector<8x8xf32> to vector<8xf32>
    %106 = vector.shape_cast %105 : vector<8xf32> to vector<8x1xf32>
    %107 = tpu.reciprocal %106 : vector<8x1xf32> -> vector<8x1xf32>
    %108 = vector.broadcast %107 : vector<8x1xf32> to vector<8x8xf32>
    %109 = arith.mulf %104, %108 : vector<8x8xf32>
    %c3 = arith.constant 3 : index
    %c0_39 = arith.constant 0 : index
    %c0_40 = arith.constant 0 : index
    %110 = vector.load %arg6[%c3, %c0_39, %c0_40] : memref<4x8x8xf32, #tpu.memory_space<vmem>>, vector<1x8x8xf32>
    %111 = vector.shape_cast %110 : vector<1x8x8xf32> to vector<8x8xf32>
    %112 = vector.shape_cast %109 : vector<8x8xf32> to vector<1x8x8xf32>
    tpu.vector_store %arg6[%c3, %c0_39, %c0_40], %112 {strides = array<i32>} : memref<4x8x8xf32, #tpu.memory_space<vmem>>, vector<1x8x8xf32>,
    %113 = arith.truncf %109 : vector<8x8xf32> to vector<8x8xbf16>
    %114 = arith.truncf %96 : vector<8x16xf32> to vector<8x16xbf16>
    %cst_41 = arith.constant dense<0.000000e+00> : vector<8x16xf32>
    %115 = tpu.matmul %113, %114, %cst_41 {dimension_numbers = #tpu.dot_dimension_numbers<[1], [0], [0], [1], [0, 0, 1, 1], [], []>} : vector<8x8xbf16>, vector<8x16xbf16>, vector<8x16xf32> -> vector<8x16xf32>
    %c48 = arith.constant 48 : index
    %c0_42 = arith.constant 0 : index
    %116 = vector.load %arg3[%c48, %c0_42] : memref<64x128xbf16, #tpu.memory_space<vmem>>, vector<16x128xbf16>
    %117 = arith.truncf %115 : vector<8x16xf32> to vector<8x16xbf16>
    %cst_43 = arith.constant dense<0.000000e+00> : vector<8x128xf32>
    %118 = tpu.matmul %117, %116, %cst_43 {dimension_numbers = #tpu.dot_dimension_numbers<[1], [0], [0], [1], [0, 0, 1, 1], [], []>} : vector<8x16xbf16>, vector<16x128xbf16>, vector<8x128xf32> -> vector<8x128xf32>
    %119 = arith.addf %91, %118 : vector<8x128xf32>
    %c0_44 = arith.constant 0 : index
    %c0_45 = arith.constant 0 : index
    %120 = vector.load %arg4[%c0_44, %c0_45] : memref<1x128xf32, #tpu.memory_space<vmem>>, vector<1x128xf32>
    %121 = vector.broadcast %120 : vector<1x128xf32> to vector<8x128xf32>
    %122 = arith.addf %119, %121 : vector<8x128xf32>
    %c0_46 = arith.constant 0 : index
    %c0_47 = arith.constant 0 : index
    %123 = vector.load %arg5[%c0_46, %c0_47] : memref<8x128xf32, #tpu.memory_space<vmem>>, vector<8x128xf32>
    tpu.vector_store %arg5[%c0_46, %c0_47], %122 {strides = array<i32>} : memref<8x128xf32, #tpu.memory_space<vmem>>, vector<8x128xf32>,
    return
  }
}

</mosaic_0001>

<bundles_post_ra>
// kernel: encoder_layer_forward.1
= control target key start
LH: loop header
LB: loop body
LE: loop exit
PB: predicated region body
PF: predicated region fallthrough
CT: control target
= control target key end

     0   :  { %12 = vsyncpa [#allocation3], 0  ;;  %s1355_s0 = inlined_call_operand.hbm [shape: f32[8,32], index: 0, kind: input, shape index: {}]   ;;  %s1356_s1 = inlined_call_operand.hbm [shape: bf16[32,192], index: 1, kind: input, shape index: {}]   ;;  %s1357_s2 = inlined_call_operand.vmem [shape: f32[1,192], index: 2, kind: input, shape index: {}]   ;;  %s1358_s3 = inlined_call_operand.hbm [shape: bf16[64,128], index: 3, kind: input, shape index: {}]   ;;  %s1359_s4 = inlined_call_operand.vmem [shape: f32[1,128], index: 4, kind: input, shape index: {}]   ;;  %s1360_s5 = inlined_call_operand.hbm [shape: f32[8,128], index: 5, kind: output, shape index: {0}]   ;;  %s1361_s6 = inlined_call_operand.hbm [shape: f32[4,8,8], index: 6, kind: output, shape index: {1}]  }
   0x1   :  { %13 = vsyncpa [#allocation6], 0 }
   0x2   :  { %14 = vsyncpa [#allocation4], 0 }
   0x3   :  { %15 = vsyncpa [#allocation10], 0  ;;  %s1134_s21 = smov [#allocation5]   ;;  %s1016_s25 = scalar_lea.hbm %s1356_s1, 512 }
   0x4   :  { %s31_s22 = sshll.u32 %s1134_s21, 4  ;;  %p1017_p0 = scmp.ne.s32.totalorder %s1356_s1, %s1016_s25  ;;  %s32_s22 = int_to_ptr.vmem [resolvable:$true] %s31_s22 }
   0x5   :  { %p1020_p1 = scmp.lt.u32.totalorder %s1016_s25, %s1356_s1 }
   0x7   :  { %p1022_p2 = pnand %p1020_p1, %p1017_p0 }
   0x9   :  { %1025 = shalt.err (!%p1022_p2)
}
   0xa   :  { %s1026_s30 = scalar_lea.vmem %s32_s22, 512  ;;  %p1031_p4 = scmp.lt.s32.totalorder %s32_s22, %s32_s22 }
   0xb   :  { %p1027_p3 = scmp.ne.s32.totalorder %s32_s22, %s1026_s30  ;;  %p1032_p5 = scmp.lt.s32.totalorder %s1026_s30, %s1026_s30 }
   0xd   :  { %p1033_p6 = por %p1032_p5, %p1031_p4 }
   0xf   :  { %p1034_p7 = pnand %p1033_p6, %p1027_p3 }
  0x11   :  { %1037 = shalt.err (!%p1034_p7)
}
  0x12   :  { %s1135_s7 = smov 128   ;;  %s1136_s8 = smov 8  }
  0x13   :  { %37 = dma.hbm_to_vmem [thread:$0]  %s1356_s1, 512, %s32_s22, [#allocation6], %s1135_s7, %s1135_s7, %s1136_s8  }
  0x14   :  { %s1137_s11 = smov [#allocation2]   ;;  %s1138_s13 = smov [#allocation7]  }
  0x15   :  { %s22_s12 = sshll.u32 %s1137_s11, 4  ;;  %s45_s14 = sshll.u32 %s1138_s13, 4  ;;  %s23_s12 = int_to_ptr.vmem [resolvable:$true] %s22_s12  ;;  %s46_s14 = int_to_ptr.vmem [resolvable:$true] %s45_s14 }
  0x16   :  { %s1038_s17 = scalar_lea.hbm %s1355_s0, 128 }
  0x17   :  { %p1039_p8 = scmp.ne.s32.totalorder %s1355_s0, %s1038_s17  ;;  %p1042_p9 = scmp.lt.u32.totalorder %s1038_s17, %s1355_s0 }
  0x19   :  { %p1044_p10 = pnand %p1042_p9, %p1039_p8 }
  0x1b   :  { %1047 = shalt.err (!%p1044_p10)
}
  0x1c   :  { %s1048_s1 = scalar_lea.vmem %s23_s12, 128  ;;  %p1053_p12 = scmp.lt.s32.totalorder %s23_s12, %s23_s12 }
  0x1d   :  { %p1049_p11 = scmp.ne.s32.totalorder %s23_s12, %s1048_s1  ;;  %p1054_p13 = scmp.lt.s32.totalorder %s1048_s1, %s1048_s1 }
  0x1f   :  { %p1055_p0 = por %p1054_p13, %p1053_p12 }
  0x21   :  { %p1056_p1 = pnand %p1055_p0, %p1049_p11 }
  0x23   :  { %1059 = shalt.err (!%p1056_p1)
}
  0x24   :  { %25 = dma.hbm_to_vmem [thread:$0]  %s1355_s0, 128, %s23_s12, [#allocation3]  }
  0x25   :  { %s1060_s26 = scalar_lea.hbm %s1358_s3, 512 }
  0x26   :  { %p1061_p2 = scmp.ne.s32.totalorder %s1358_s3, %s1060_s26  ;;  %p1064_p3 = scmp.lt.u32.totalorder %s1060_s26, %s1358_s3 }
  0x28   :  { %p1066_p4 = pnand %p1064_p3, %p1061_p2 }
  0x2a   :  { %1069 = shalt.err (!%p1066_p4)
}
  0x2b   :  { %s1070_s9 = scalar_lea.vmem %s46_s14, 512  ;;  %p1075_p6 = scmp.lt.s32.totalorder %s46_s14, %s46_s14 }
  0x2c   :  { %p1071_p5 = scmp.ne.s32.totalorder %s46_s14, %s1070_s9  ;;  %p1076_p7 = scmp.lt.s32.totalorder %s1070_s9, %s1070_s9 }
  0x2e   :  { %p1077_p8 = por %p1076_p7, %p1075_p6 }
  0x30   :  { %p1078_p9 = pnand %p1077_p8, %p1071_p5 }
  0x32   :  { %1081 = shalt.err (!%p1078_p9)
}
  0x33   :  { %s1139_s0 = smov 64   ;;  %s1140_s10 = smov 4  }
  0x34   :  { %51 = dma.hbm_to_vmem [thread:$0]  %s1358_s3, 512, %s46_s14, [#allocation6], %s1139_s0, %s1139_s0, %s1140_s10  }
  0x35   :  { %1126 = dma.done.wait [#allocation3], 128  }
  0x36   :  { %1127 = vsyncadd [#allocation3], 4294967168 }
  0x37   :  { %1128 = dma.done.wait [#allocation6], 1024  }
  0x38   :  { %1129 = vsyncadd [#allocation6], 4294966272  ;;  %v1141_v0 = vmov 0   ;;  %v990_v1 = vld [vmem:[#allocation5 + $0x4] ss:$8 sps:$4 sm:$0xff]   ;;  %v64_v5 = vld [vmem:[#allocation2] sm:$0xff]  ;;  %v72_v7 = vlaneseq }
  0x39   :  { %138 = vmatprep.mubr.bf16.mxu0 %v1141_v0  ;;  %v992_v2 = vld [vmem:[#allocation5] ss:$8 sps:$4 sm:$0xff]   ;;  %106 = vmatprep.subr.bf16.mxu0 %v990_v1  ;;  %v993_v3 = vld [vmem:[#allocation5 + $0x14] ss:$8 sps:$4 sm:$0xff]   ;;  %v995_v4 = vld [vmem:[#allocation5 + $0x10] ss:$8 sps:$4 sm:$0xff]   ;;  %v65_v6 = vpack.c.bf16 %v64_v5, %v64_v5 }
  0x3a   :  { %107 = vmatpush1.bf16.msra.mxu0 %v992_v2  ;;  %vm102_vm0 = vcmask 261120   ;;  %v1228_v8 = vshrl.u32 %v72_v7, 7  ;;  %v1142_v9 = vmov 0.0   ;;  %v1236_v11 = vld [vmem:[%s1357_s2] sm:$0x3]  ;;  %vm1143_vm1 = vmmov 0  }
  0x3b   :  { %108 = vmatprep.subr.bf16.mxu0 %v993_v3  ;;  %900 = vmatprep.subr.bf16.mxu1 %v1142_v9  ;;  %s1144_s2 = smov 112   ;;  %s1145_s14 = smov 80   ;;  %vm153_vm2 = vcmask 130048   ;;  %vm200_vm3 = vcmask 64512   ;;  %vm219_vm4 = vcmask 1043456   ;;  %v996_v57 = vld [vmem:[#allocation7] sm:$0xff]  }
  0x3c   :  { %v74_v10 = vsub.s32 0, %v1228_v8  ;;  %902 = vmatprep.mubr.msk.bf16.mxu1 %vm1143_vm1, %v1142_v9  ;;  %s1146_s15 = smov 96   ;;  %s1147_s16 = smov 48   ;;  %v997_v59 = vld [vmem:[#allocation7 + $0x8] sm:$0xff]   ;;  %v78_v60 = vsub.s32 1, %v1228_v8 }
  0x3d   :  { %s1148_s17 = smov 32   ;;  %s1149_s18 = smov 16  }
  0x3e   :  { %109 = vmatpush1.bf16.msra.mxu0 %v995_v4  ;;  %v75_v12 = vrot.slane %v1236_v11, %v74_v10  ;;  %v79_v61 = vrot.slane %v1236_v11, %v78_v60  ;;  %s1150_s19 = smov [#allocation9]  }
  0x3f   :  { %906 = vmatprep.subr.bf16.mxu0 %v1142_v9  ;;  %s837_s20 = sshll.u32 %s1150_s19, 4  ;;  %s838_s20 = int_to_ptr.vmem [resolvable:$true] %s837_s20 }
  0x40   :  { %s1082_s21 = scalar_lea.vmem %s838_s20, 512  ;;  %p1087_p11 = scmp.lt.s32.totalorder %s838_s20, %s838_s20 }
  0x41   :  { %858 = vmatmul.mubr.msk.bf16.vlgmr.msra.gmra.mrb[0].mxu0 %vm102_vm0, %v65_v6  ;;  %p1083_p10 = scmp.ne.s32.totalorder %s838_s20, %s1082_s21  ;;  %p1088_p12 = scmp.lt.s32.totalorder %s1082_s21, %s1082_s21 }
  0x42   :  { %908 = vmatprep.mubr.msk.bf16.mxu0 %vm1143_vm1, %v1142_v9 }
  0x43   :  { %p1089_p13 = por %p1088_p12, %p1087_p11 }
  0x45   :  { %p1090_p0 = pnand %p1089_p13, %p1083_p10 }
 0x114   :  { %v140_v13 = vpop.f32.mrb[0].mxu0 }
 0x115   :  { %v141_v14 = vadd.f32 %v140_v13, %v75_v12  ;;  %v1243_v15 = vpop.f32.mrb[1].mxu0 }
 0x116   :  { %v144_v16 = vpop.f32.mrb[2].mxu0  ;;  %v143_v62 = vadd.f32 %v1243_v15, %v79_v61 }
 0x117   :  { %v147_v17 = vmul.f32 0.25, %v141_v14  ;;  %v149_v18 = vpack.c.bf16 %v141_v14, %v141_v14  ;;  %v145_v19 = vpop.f32.mrb[3].mxu0 }
 0x118   :  { %v1280_v63 = vpack.c.bf16 %v143_v62, %v143_v62 }
 0x119   :  { %v148_v20 = vpack.c.bf16 %v147_v17, %v147_v17  ;;  %151 = vrot.lane.b32.xlu0 %v149_v18, %s1144_s2 }
 0x11a   :  { %v549_v5 = vsel %vm219_vm4, %v1280_v63, 0 }
 0x11b   :  { %267 = vrot.lane.b32.xlu1 %v148_v20, %s1145_s14 }
 0x11d   :  { %269 = vrot.lane.b32.xlu0 %v149_v18, %s1139_s0 }
 0x18b   :  { %v152_v21 = vpop.permute.xlu0 %151 }
 0x18c   :  { %v158_v22 = vsel %vm153_vm2, %v152_v21, 0 }
 0x18d   :  { %901 = vmatpush3.bf16.xpose.msra.mxu1 %v158_v22  ;;  %v268_v25 = vpop.permute.xlu1 %267 }
 0x18e   :  { %912 = vmatprep.subr.bf16.mxu1 %v1142_v9 }
 0x18f   :  { %v270_v23 = vpop.permute.xlu0 %269 }
 0x190   :  { %v275_v24 = vsel %vm153_vm2, %v270_v23, 0 }
 0x194   :  { %903 = vmatmul.mubr.msk.bf16.vlgmr.msra.gmra.mrb[0].mxu1 %vm153_vm2, %v148_v20 }
 0x195   :  { %913 = vmatpush3.bf16.xpose.msra.mxu1 %v275_v24  ;;  %914 = vmatprep.mubr.msk.bf16.mxu1 %vm1143_vm1, %v1142_v9 }
 0x196   :  { %924 = vmatprep.subr.bf16.mxu1 %v1142_v9 }
 0x19c   :  { %915 = vmatmul.mubr.msk.bf16.vlgmr.msra.gmra.mrb[4].mxu1 %vm153_vm2, %v268_v25 }
 0x19d   :  { %926 = vmatprep.mubr.msk.bf16.mxu1 %vm1143_vm1, %v1142_v9  ;;  %925 = vmatpush3.bf16.msra.mxu1 %v997_v59  ;;  %v999_v59 = vld [vmem:[#allocation7 + $0x18] sm:$0xff]  }
 0x19e   :  { %936 = vmatprep.subr.bf16.mxu1 %v1142_v9 }
 0x267   :  { %v194_v26 = vpop.f32.mrb[0].mxu1 }
 0x268   :  { %v904_v27 = vpop.f32.mrb[1].mxu1  ;;  %v201_v28 = vsel %vm200_vm3, %v194_v26, -inf }
 0x269   :  { %202 = vmax.xlane.f32.xlu1 %v201_v28  ;;  %v197_v29 = vpop.f32.mrb[2].mxu1 }
 0x26a   :  { %v905_v30 = vpop.f32.mrb[3].mxu1  ;;  %v644_v29 = vmul.f32 0.25, %v143_v62 }
 0x26c   :  { %v645_v30 = vpack.c.bf16 %v644_v29, %v644_v29 }
 0x26f   :  { %v311_v31 = vpop.f32.mrb[4].mxu1 }
 0x270   :  { %v916_v32 = vpop.f32.mrb[5].mxu1  ;;  %v317_v33 = vsel %vm200_vm3, %v311_v31, -inf }
 0x271   :  { %318 = vmax.xlane.f32.xlu0 %v317_v33  ;;  %v314_v34 = vpop.f32.mrb[6].mxu1 }
 0x272   :  { %v917_v35 = vpop.f32.mrb[7].mxu1 }
 0x2f6   :  { %v203_v36 = vpop.xlane.xlu1 %202 }
 0x2f7   :  { %v204_v37 = vsub.f32 %v194_v26, %v203_v36 }
 0x2f9   :  { %v205_v38 = vmul.f32 1.442695, %v204_v37 }
 0x2fb   :  { %1000 = vpow2.f32 %v205_v38 }
 0x2fe   :  { %v319_v39 = vpop.xlane.xlu0 %318 }
 0x2ff   :  { %v320_v40 = vsub.f32 %v311_v31, %v319_v39 }
 0x301   :  { %v321_v41 = vmul.f32 1.442695, %v320_v40 }
 0x303   :  { %1002 = vpow2.f32 %v321_v41 }
 0x305   :  { %v1001_v42 = vpop.eup %1000 }
 0x306   :  { %v207_v43 = vsel %vm200_vm3, %v1001_v42, 0.0 }
 0x307   :  { %208 = vadd.xlane.f32.xlu0 %v207_v43  ;;  %v998_v43 = vld [vmem:[#allocation7 + $0x10] sm:$0xff]  }
 0x30d   :  { %v1003_v44 = vpop.eup %1002 }
 0x30e   :  { %v323_v45 = vsel %vm200_vm3, %v1003_v44, 0.0 }
 0x30f   :  { %324 = vadd.xlane.f32.xlu1 %v323_v45 }
 0x31d   :  { %214 = vrot.lane.b32.xlu0 %v149_v18, %s1146_s15 }
 0x320   :  { %331 = vrot.lane.b32.xlu1 %v149_v18, %s1147_s16 }
 0x321   :  { %480 = vrot.lane.b32.xlu0 %v148_v20, %s1148_s17 }
 0x324   :  { %482 = vrot.lane.b32.xlu1 %v149_v18, %s1149_s18 }
 0x394   :  { %v209_v46 = vpop.xlane.xlu0 %208 }
 0x395   :  { %1004 = vrcp.f32 %v209_v46 }
 0x398   :  { %v215_v47 = vpop.permute.xlu0 %214 }
 0x399   :  { %v221_v48 = vsel %vm219_vm4, %v215_v47, 0 }
 0x39a   :  { %907 = vmatpush3.bf16.msra.mxu0 %v221_v48 }
 0x39b   :  { %918 = vmatprep.subr.bf16.mxu0 %v1142_v9 }
 0x39c   :  { %v325_v49 = vpop.xlane.xlu1 %324  ;;  %v481_v14 = vpop.permute.xlu0 %480 }
 0x39d   :  { %1006 = vrcp.f32 %v325_v49 }
 0x39f   :  { %v1005_v50 = vpop.eup %1004 }
 0x3a0   :  { %v211_v51 = vmul.f32 %v1005_v50, %v1001_v42  ;;  %v332_v52 = vpop.permute.xlu1 %331 }
 0x3a1   :  { %v337_v54 = vsel %vm219_vm4, %v332_v52, 0 }
 0x3a2   :  { %212 = vst.msk [vmem:[#allocation9] sm:$0xff] %vm200_vm3, %v211_v51  ;;  %v213_v53 = vpack.c.bf16 %v211_v51, %v211_v51 }
 0x3a4   :  { %909 = vmatmul.mubr.msk.bf16.vlgmr.msra.gmra.mrb[4].mxu0 %vm200_vm3, %v213_v53  ;;  %v483_v6 = vpop.permute.xlu1 %482 }
 0x3a5   :  { %919 = vmatpush3.bf16.msra.mxu0 %v337_v54  ;;  %920 = vmatprep.mubr.msk.bf16.mxu0 %vm1143_vm1, %v1142_v9  ;;  %v488_v12 = vsel %vm153_vm2, %v483_v6, 0 }
 0x3a6   :  { %930 = vmatprep.subr.bf16.mxu0 %v1142_v9 }
 0x3a7   :  { %v1007_v55 = vpop.eup %1006 }
 0x3a8   :  { %v327_v56 = vmul.f32 %v1007_v55, %v1003_v44 }
 0x3aa   :  { %329 = vst.msk [vmem:[#allocation9 + $0x8] sm:$0xff] %vm200_vm3, %v327_v56  ;;  %v330_v58 = vpack.c.bf16 %v327_v56, %v327_v56 }
 0x3ac   :  { %921 = vmatmul.mubr.msk.bf16.vlgmr.msra.gmra.mrb[8].mxu0 %vm200_vm3, %v330_v58 }
 0x3ad   :  { %931 = vmatpush3.bf16.msra.mxu0 %v996_v57  ;;  %932 = vmatprep.mubr.msk.bf16.mxu0 %vm1143_vm1, %v1142_v9 }
 0x3ae   :  { %942 = vmatprep.subr.bf16.mxu0 %v1142_v9 }
 0x477   :  { %v257_v0 = vpop.f32.mrb[4].mxu0 }
 0x478   :  { %v265_v1 = vpack.c.bf16 %v257_v0, %v257_v0  ;;  %v910_v2 = vpop.f32.mrb[5].mxu0 }
 0x479   :  { %v260_v3 = vpop.f32.mrb[6].mxu0 }
 0x47a   :  { %v911_v4 = vpop.f32.mrb[7].mxu0  ;;  %933 = vmatmul.mubr.msk.bf16.vlgmr.msra.gmra.mrb[12].mxu0 %vm153_vm2, %v265_v1 }
 0x47b   :  { %943 = vmatpush3.bf16.msra.mxu0 %v549_v5  ;;  %944 = vmatprep.mubr.msk.bf16.mxu0 %vm1143_vm1, %v1142_v9 }
 0x47c   :  { %954 = vmatprep.subr.bf16.mxu0 %v1142_v9 }
 0x47f   :  { %v373_v7 = vpop.f32.mrb[8].mxu0 }
 0x480   :  { %v381_v8 = vpack.c.bf16 %v373_v7, %v373_v7  ;;  %v922_v10 = vpop.f32.mrb[9].mxu0 }
 0x481   :  { %v376_v11 = vpop.f32.mrb[10].mxu0 }
 0x482   :  { %v923_v13 = vpop.f32.mrb[11].mxu0  ;;  %927 = vmatmul.mubr.msk.bf16.vlgmr.msra.gmra.mrb[8].mxu1 %vm153_vm2, %v381_v8 }
 0x483   :  { %937 = vmatpush3.bf16.xpose.msra.mxu1 %v488_v12  ;;  %938 = vmatprep.mubr.msk.bf16.mxu1 %vm1143_vm1, %v1142_v9 }
 0x484   :  { %948 = vmatprep.subr.bf16.mxu1 %v1142_v9 }
 0x48a   :  { %939 = vmatmul.mubr.msk.bf16.vlgmr.msra.gmra.mrb[12].mxu1 %vm153_vm2, %v481_v14 }
 0x48b   :  { %950 = vmatprep.mubr.msk.bf16.mxu1 %vm1143_vm1, %v1142_v9  ;;  %949 = vmatpush3.bf16.msra.mxu1 %v998_v43 }
 0x48c   :  { %960 = vmatprep.subr.bf16.mxu1 %v1142_v9 }
 0x54d   :  { %v474_v15 = vpop.f32.mrb[12].mxu0 }
 0x54e   :  { %v934_v16 = vpop.f32.mrb[13].mxu0 }
 0x54f   :  { %v477_v17 = vpop.f32.mrb[14].mxu0 }
 0x550   :  { %v935_v18 = vpop.f32.mrb[15].mxu0 }
 0x555   :  { %v425_v19 = vpop.f32.mrb[8].mxu1 }
 0x556   :  { %v1296_v20 = vadd.f32 %v474_v15, %v425_v19  ;;  %v928_v21 = vpop.f32.mrb[9].mxu1 }
 0x557   :  { %v428_v22 = vpop.f32.mrb[10].mxu1 }
 0x558   :  { %v929_v23 = vpop.f32.mrb[11].mxu1 }
 0x55d   :  { %v524_v24 = vpop.f32.mrb[12].mxu1 }
 0x55e   :  { %v940_v25 = vpop.f32.mrb[13].mxu1  ;;  %v530_v26 = vsel %vm200_vm3, %v524_v24, -inf }
 0x55f   :  { %531 = vmax.xlane.f32.xlu1 %v530_v26  ;;  %v527_v27 = vpop.f32.mrb[14].mxu1 }
 0x560   :  { %v941_v28 = vpop.f32.mrb[15].mxu1 }
 0x570   :  { %647 = vrot.lane.b32.xlu1 %v645_v30, %s1144_s2 }
 0x5ec   :  { %v532_v31 = vpop.xlane.xlu1 %531 }
 0x5ed   :  { %v533_v32 = vsub.f32 %v524_v24, %v532_v31 }
 0x5ef   :  { %v534_v33 = vmul.f32 1.442695, %v533_v32 }
 0x5f0   :  { %v648_v42 = vpop.permute.xlu1 %647 }
 0x5f1   :  { %1008 = vpow2.f32 %v534_v33 }
 0x5fb   :  { %v1009_v34 = vpop.eup %1008 }
 0x5fc   :  { %v536_v35 = vsel %vm200_vm3, %v1009_v34, 0.0 }
 0x5fd   :  { %537 = vadd.xlane.f32.xlu0 %v536_v35 }
 0x613   :  { %650 = vrot.lane.b32.xlu0 %v1280_v63, %s1146_s15 }
 0x68a   :  { %v538_v36 = vpop.xlane.xlu0 %537 }
 0x68b   :  { %1010 = vrcp.f32 %v538_v36 }
 0x68e   :  { %v651_v39 = vpop.permute.xlu0 %650 }
 0x68f   :  { %v656_v41 = vsel %vm153_vm2, %v651_v39, 0 }
 0x695   :  { %v1011_v37 = vpop.eup %1010 }
 0x696   :  { %v540_v38 = vmul.f32 %v1011_v37, %v1009_v34 }
 0x698   :  { %542 = vst.msk [vmem:[#allocation9 + $0x10] sm:$0xff] %vm200_vm3, %v540_v38  ;;  %v543_v40 = vpack.c.bf16 %v540_v38, %v540_v38 }
 0x69a   :  { %945 = vmatmul.mubr.msk.bf16.vlgmr.msra.gmra.mrb[16].mxu0 %vm200_vm3, %v543_v40 }
 0x69b   :  { %955 = vmatpush3.bf16.xpose.msra.mxu0 %v656_v41  ;;  %956 = vmatprep.mubr.msk.bf16.mxu0 %vm1143_vm1, %v1142_v9 }
 0x69c   :  { %966 = vmatprep.subr.bf16.mxu0 %v1142_v9 }
 0x6a2   :  { %957 = vmatmul.mubr.msk.bf16.vlgmr.msra.gmra.mrb[20].mxu0 %vm153_vm2, %v648_v42 }
 0x6a3   :  { %968 = vmatprep.mubr.msk.bf16.mxu0 %vm1143_vm1, %v1142_v9  ;;  %967 = vmatpush3.bf16.msra.mxu0 %v999_v59 }
 0x76d   :  { %v585_v44 = vpop.f32.mrb[16].mxu0 }
 0x76e   :  { %v593_v45 = vpack.c.bf16 %v585_v44, %v585_v44  ;;  %v946_v46 = vpop.f32.mrb[17].mxu0 }
 0x76f   :  { %v588_v47 = vpop.f32.mrb[18].mxu0 }
 0x770   :  { %v947_v48 = vpop.f32.mrb[19].mxu0  ;;  %951 = vmatmul.mubr.msk.bf16.vlgmr.msra.gmra.mrb[16].mxu1 %vm153_vm2, %v593_v45 }
 0x771   :  { %962 = vmatprep.mubr.msk.bf16.mxu1 %vm1143_vm1, %v1142_v9 }
 0x775   :  { %v692_v49 = vpop.f32.mrb[20].mxu0 }
 0x776   :  { %v958_v50 = vpop.f32.mrb[21].mxu0  ;;  %v698_v51 = vsel %vm200_vm3, %v692_v49, -inf }
 0x777   :  { %699 = vmax.xlane.f32.xlu1 %v698_v51  ;;  %v695_v52 = vpop.f32.mrb[22].mxu0 }
 0x778   :  { %v959_v53 = vpop.f32.mrb[23].mxu0 }
 0x804   :  { %v700_v54 = vpop.xlane.xlu1 %699 }
 0x805   :  { %v701_v55 = vsub.f32 %v692_v49, %v700_v54 }
 0x807   :  { %v702_v56 = vmul.f32 1.442695, %v701_v55 }
 0x809   :  { %1012 = vpow2.f32 %v702_v56 }
 0x813   :  { %v1013_v57 = vpop.eup %1012 }
 0x814   :  { %v704_v58 = vsel %vm200_vm3, %v1013_v57, 0.0 }
 0x815   :  { %705 = vadd.xlane.f32.xlu0 %v704_v58 }
 0x82b   :  { %712 = vrot.lane.b32.xlu0 %v1280_v63, %s1145_s14 }
 0x843   :  { %v637_v9 = vpop.f32.mrb[16].mxu1 }
 0x844   :  { %v643_v60 = vadd.f32 %v637_v9, %v1296_v20  ;;  %v952_v61 = vpop.f32.mrb[17].mxu1 }
 0x845   :  { %v640_v62 = vpop.f32.mrb[18].mxu1 }
 0x846   :  { %v953_v0 = vpop.f32.mrb[19].mxu1 }
 0x8a2   :  { %v706_v1 = vpop.xlane.xlu0 %705 }
 0x8a3   :  { %1014 = vrcp.f32 %v706_v1 }
 0x8a6   :  { %v713_v2 = vpop.permute.xlu0 %712 }
 0x8a7   :  { %v718_v3 = vsel %vm219_vm4, %v713_v2, 0 }
 0x8a8   :  { %961 = vmatpush3.bf16.msra.mxu1 %v718_v3 }
 0x8ad   :  { %v1015_v4 = vpop.eup %1014 }
 0x8ae   :  { %v708_v5 = vmul.f32 %v1015_v4, %v1013_v57 }
 0x8b0   :  { %710 = vst.msk [vmem:[#allocation9 + $0x18] sm:$0xff] %vm200_vm3, %v708_v5  ;;  %v711_v6 = vpack.c.bf16 %v708_v5, %v708_v5 }
 0x8b2   :  { %963 = vmatmul.mubr.msk.bf16.vlgmr.msra.gmra.mrb[20].mxu1 %vm200_vm3, %v711_v6 }
 0x985   :  { %v754_v63 = vpop.f32.mrb[20].mxu1 }
 0x986   :  { %v762_v7 = vpack.c.bf16 %v754_v63, %v754_v63  ;;  %v964_v8 = vpop.f32.mrb[21].mxu1 }
 0x987   :  { %v757_v10 = vpop.f32.mrb[22].mxu1 }
 0x988   :  { %v965_v11 = vpop.f32.mrb[23].mxu1  ;;  %969 = vmatmul.mubr.msk.bf16.vlgmr.msra.gmra.mrb[24].mxu0 %vm153_vm2, %v762_v7 }
 0x989   :  { %1093 = shalt.err (!%p1090_p0)
}
 0x98a   :  { %s1094_s23 = scalar_lea.hbm %s1361_s6, 512 }
 0x98b   :  { %p1095_p1 = scmp.ne.s32.totalorder %s1361_s6, %s1094_s23  ;;  %p1098_p2 = scmp.lt.u32.totalorder %s1094_s23, %s1361_s6 }
 0x98d   :  { %p1100_p3 = pnand %p1098_p2, %p1095_p1 }
 0x98f   :  { %1103 = shalt.err (!%p1100_p3)
}
 0x990   :  { %843 = dma.vmem_to_hbm [thread:$0]  %s838_s20, 512, %s1361_s6, [#allocation10], %s1135_s7, %s1135_s7, %s1136_s8  }
 0x991   :  { %v875_v13 = vld [vmem:[%s1359_s4] ss:$0 sm:$0xff]  ;;  %s1151_s0 = smov [#allocation8]  }
 0x992   :  { %s828_s10 = sshll.u32 %s1151_s0, 4  ;;  %s829_s10 = int_to_ptr.vmem [resolvable:$true] %s828_s10 }
 0x993   :  { %s1104_s11 = scalar_lea.vmem %s829_s10, 128  ;;  %p1109_p5 = scmp.lt.s32.totalorder %s829_s10, %s829_s10 }
 0x994   :  { %p1105_p4 = scmp.ne.s32.totalorder %s829_s10, %s1104_s11  ;;  %p1110_p6 = scmp.lt.s32.totalorder %s1104_s11, %s1104_s11 }
 0x996   :  { %p1111_p7 = por %p1110_p6, %p1109_p5 }
 0x998   :  { %p1112_p8 = pnand %p1111_p7, %p1105_p4 }
 0xa5b   :  { %v806_v12 = vpop.f32.mrb[24].mxu0 }
 0xa5c   :  { %v812_v14 = vadd.f32 %v806_v12, %v643_v60  ;;  %v970_v15 = vpop.f32.mrb[25].mxu0 }
 0xa5d   :  { %v809_v16 = vpop.f32.mrb[26].mxu0 }
 0xa5e   :  { %v820_v17 = vadd.f32 %v875_v13, %v812_v14  ;;  %v971_v18 = vpop.f32.mrb[27].mxu0 }
 0xa60   :  { %821 = vst [vmem:[#allocation8] sm:$0xff] %v820_v17 }
 0xa61   :  { %1115 = shalt.err (!%p1112_p8)
}
 0xa62   :  { %s1116_s4 = scalar_lea.hbm %s1360_s5, 128 }
 0xa63   :  { %p1117_p9 = scmp.ne.s32.totalorder %s1360_s5, %s1116_s4  ;;  %p1120_p10 = scmp.lt.u32.totalorder %s1116_s4, %s1360_s5 }
 0xa65   :  { %p1122_p11 = pnand %p1120_p10, %p1117_p9 }
 0xa67   :  { %1125 = shalt.err (!%p1122_p11)
}
 0xa68   :  { %831 = dma.vmem_to_hbm [thread:$0]  %s829_s10, 128, %s1360_s5, [#allocation4]  }
 0xa69   :  { %1130 = dma.done.wait [#allocation4], 128  }
 0xa6a   :  { %1131 = vsyncadd [#allocation4], 4294967168 }
 0xa6b   :  { %1132 = dma.done.wait [#allocation10], 512  }
 0xa6c   :  { %1133 = vsyncadd [#allocation10], 4294966784 }
 0xa6d   :  { %850 = vsyncpa [#allocation3], 1 }
 0xa6e   :  { %851 = vsyncpa [#allocation6], 1 }
 0xa6f   :  { %852 = vsyncpa [#allocation4], 1 }
 0xa70   :  { %853 = vsyncpa [#allocation10], 1 }

</bundles_post_ra>
